<compile_context>
chip_gen: v5e
topology: v5e:2x2
jax: 0.10.0
libtpu: 0.0.40
codegen_flags: <defaults>
</compile_context>

<pallas_src>
import jax
import jax.numpy as jnp
from jax import lax
from jax.experimental import pallas as pl
from jax.experimental.pallas import tpu as pltpu

NUM_CLASSES = 10
LANE = 128           # TPU lane width: pad hidden/class dims to this
NEG_INF = -1e30      # finite "-inf" for masking padded class logits


def fmnist_kernel(x_ref, w1_ref, w2_ref, o_ref):
    """Fused fc1 -> ReLU -> fc2 -> masked softmax on one batch tile.

    x_ref  : [TN, 784]        input rows for this grid step
    w1_ref : [K_pad, 784]     fc1.weight, PyTorch [out, in] layout, K zero-padded
    w2_ref : [C_pad, K_pad]   fc2.weight, PyTorch [out, in] layout, zero-padded
    o_ref  : [TN, C_pad]      softmax probs (padded classes hold ~0)
    """
    # fc1: x @ W1^T  (contract input-feature axes; MXU, f32 accumulation)
    h = lax.dot_general(
        x_ref[...], w1_ref[...],
        dimension_numbers=(((1,), (1,)), ((), ())),
        preferred_element_type=jnp.float32)
    h = jnp.maximum(h, 0.0)                                   # [TN, K_pad]

    # fc2: h @ W2^T
    logits = lax.dot_general(
        h, w2_ref[...],
        dimension_numbers=(((1,), (1,)), ((), ())),
        preferred_element_type=jnp.float32)                   # [TN, C_pad]

    # Mask the padded class columns so softmax is over the real 10 classes.
    col = lax.broadcasted_iota(jnp.int32, logits.shape, 1)
    logits = jnp.where(col < NUM_CLASSES, logits, jnp.float32(NEG_INF))

    # Numerically stable softmax over dim 1.
    m = jnp.max(logits, axis=-1, keepdims=True)
    e = jnp.exp(logits - m)
    denom = jnp.sum(e, axis=-1, keepdims=True)
    o_ref[...] = (e * pl.reciprocal(denom, approx=False)).astype(o_ref.dtype)


def _round_up(n, m):
    return ((n + m - 1) // m) * m


def pad_weights(w1, w2):
    """One-time (model-load) prep: keep PyTorch [out, in] layout, zero-pad the
    hidden dim K and the class dim to lane width. Exact: padded hidden units
    produce 0 after ReLU and padded class rows are masked in the kernel."""
    K, D = w1.shape          # fc1.weight: [K, 784]
    C, K2 = w2.shape         # fc2.weight: [10, K]
    assert K == K2 and C == NUM_CLASSES
    k_pad = max(LANE, _round_up(K, LANE))
    c_pad = LANE
    w1_p = jnp.zeros((k_pad, D), w1.dtype).at[:K, :].set(w1)
    w2_p = jnp.zeros((c_pad, k_pad), w2.dtype).at[:C, :K].set(w2)
    return w1_p, w2_p


def fmnist_forward(x, w1_p, w2_p, *, batch_tile=256):
    """x: [N, 784] f32; w1_p/w2_p: padded weights from pad_weights()."""
    N, D = x.shape
    k_pad, d1 = w1_p.shape
    c_pad, k2 = w2_p.shape
    assert d1 == D and k2 == k_pad

    # Small batches run as one full-extent block; large batches are gridded
    # over rows at the MXU-native tile height with weights held resident.
    tn = N if N <= batch_tile else batch_tile
    grid = (pl.cdiv(N, tn),)

    cost = pl.CostEstimate(
        flops=2 * N * D * k_pad + 2 * N * k_pad * c_pad,
        transcendentals=N * c_pad,
        bytes_accessed=4 * (N * D + k_pad * D + c_pad * k_pad + N * c_pad),
    )

    out_padded = pl.pallas_call(
        fmnist_kernel,
        out_shape=jax.ShapeDtypeStruct((N, c_pad), jnp.float32),
        grid=grid,
        in_specs=[
            pl.BlockSpec((tn, D), lambda i: (i, 0)),        # batch-tiled x
            pl.BlockSpec((k_pad, D), lambda i: (0, 0)),     # resident weights
            pl.BlockSpec((c_pad, k_pad), lambda i: (0, 0)),
        ],
        out_specs=pl.BlockSpec((tn, c_pad), lambda i: (i, 0)),
        compiler_params=pltpu.CompilerParams(
            dimension_semantics=("parallel",)),
        cost_estimate=cost,
    )(x, w1_p, w2_p)

    return out_padded[:, :NUM_CLASSES]


def reference_forward(x, w1, w2):
    h = jnp.maximum(x @ w1.T, 0.0)
    logits = h @ w2.T
    return jax.nn.softmax(logits, axis=-1)


if __name__ == "__main__":
    # Small deterministic setup: batch N=8, hidden K=32, input dim 784, 10 classes.
    N, D, K, C = 8, 28 * 28, 32, 10
    key = jax.random.PRNGKey(0)
    kx, kw1, kw2 = jax.random.split(key, 3)

    x = jax.random.normal(kx, (N, D), dtype=jnp.float32)
    # nn.init.normal_ defaults: mean=0, std=1
    w1 = jax.random.normal(kw1, (K, D), dtype=jnp.float32)   # fc1.weight [K, 784]
    w2 = jax.random.normal(kw2, (C, K), dtype=jnp.float32)   # fc2.weight [10, K]

    # One-time weight prep (model-load time), then the per-call forward.
    w1_p, w2_p = pad_weights(w1, w2)
    out = fmnist_forward(x, w1_p, w2_p)
    out = jax.block_until_ready(out)

    ref = reference_forward(x, w1, w2)
    assert out.shape == (N, C)
    assert jnp.allclose(out, ref, atol=1e-5, rtol=1e-5), "mismatch vs reference"
    assert jnp.allclose(jnp.sum(out, axis=-1), 1.0, atol=1e-5), "softmax rows must sum to 1"

    print("KERNEL_OK")
</pallas_src>

<mosaic_0001>
module attributes {stable_mosaic.version = 11 : i64} {
  func.func @fmnist_kernel(%arg0: i32, %arg1: memref<8x784xf32, #tpu.memory_space<vmem>>, %arg2: memref<128x784xf32, #tpu.memory_space<vmem>>, %arg3: memref<128x128xf32, #tpu.memory_space<vmem>>, %arg4: memref<8x128xf32, #tpu.memory_space<vmem>>) attributes {dimension_semantics = [#tpu.dimension_semantics<parallel>], iteration_bounds = array<i64: 1>, scalar_prefetch = 0 : i64, scratch_operands = 0 : i64, tpu.core_type = #tpu.core_type<tc>, window_params = [{transform_indices = @transform_0, window_bounds = array<i64: 8, 784>}, {pipeline_mode = #tpu.pipeline_mode<synchronous>, transform_indices = @transform_1, window_bounds = array<i64: 128, 784>}, {pipeline_mode = #tpu.pipeline_mode<synchronous>, transform_indices = @transform_2, window_bounds = array<i64: 128, 128>}, {transform_indices = @transform_3, window_bounds = array<i64: 8, 128>}]} {
    %c0 = arith.constant 0 : index
    %c0_0 = arith.constant 0 : index
    %0 = vector.load %arg1[%c0, %c0_0] : memref<8x784xf32, #tpu.memory_space<vmem>>, vector<8x784xf32>
    %c0_1 = arith.constant 0 : index
    %c0_2 = arith.constant 0 : index
    %1 = vector.load %arg2[%c0_1, %c0_2] : memref<128x784xf32, #tpu.memory_space<vmem>>, vector<128x784xf32>
    %cst = arith.constant dense<0.000000e+00> : vector<8x128xf32>
    %2 = tpu.matmul %0, %1, %cst {dimension_numbers = #tpu.dot_dimension_numbers<[1], [1], [0], [0], [0, 0, 1, 0], [], []>} : vector<8x784xf32>, vector<128x784xf32>, vector<8x128xf32> -> vector<8x128xf32>
    %cst_3 = arith.constant 0.000000e+00 : f32
    %3 = vector.broadcast %cst_3 : f32 to vector<8x128xf32>
    %4 = arith.maximumf %2, %3 : vector<8x128xf32>
    %c0_4 = arith.constant 0 : index
    %c0_5 = arith.constant 0 : index
    %5 = vector.load %arg3[%c0_4, %c0_5] : memref<128x128xf32, #tpu.memory_space<vmem>>, vector<128x128xf32>
    %cst_6 = arith.constant dense<0.000000e+00> : vector<8x128xf32>
    %6 = tpu.matmul %4, %5, %cst_6 {dimension_numbers = #tpu.dot_dimension_numbers<[1], [1], [0], [0], [0, 0, 1, 0], [], []>} : vector<8x128xf32>, vector<128x128xf32>, vector<8x128xf32> -> vector<8x128xf32>
    %7 = tpu.iota {dimensions = array<i32: 1>} : vector<8x128xi32>
    %c10_i32 = arith.constant 10 : i32
    %8 = vector.broadcast %c10_i32 : i32 to vector<8x128xi32>
    %9 = arith.cmpi slt, %7, %8 : vector<8x128xi32>
    %cst_7 = arith.constant -1.000000e+30 : f32
    %10 = vector.broadcast %cst_7 : f32 to vector<8x128xf32>
    %11 = arith.select %9, %6, %10 : vector<8x128xi1>, vector<8x128xf32>
    %cst_8 = arith.constant dense<0xFF800000> : vector<8xf32>
    %12 = vector.multi_reduction <maximumf>, %11, %cst_8 [1] : vector<8x128xf32> to vector<8xf32>
    %13 = vector.shape_cast %12 : vector<8xf32> to vector<8x1xf32>
    %14 = vector.broadcast %13 : vector<8x1xf32> to vector<8x128xf32>
    %15 = arith.subf %11, %14 : vector<8x128xf32>
    %16 = math.exp %15 : vector<8x128xf32>
    %cst_9 = arith.constant dense<0.000000e+00> : vector<8xf32>
    %17 = vector.multi_reduction <add>, %16, %cst_9 [1] : vector<8x128xf32> to vector<8xf32>
    %18 = vector.shape_cast %17 : vector<8xf32> to vector<8x1xf32>
    %19 = tpu.reciprocal %18 : vector<8x1xf32> -> vector<8x1xf32>
    %20 = vector.broadcast %19 : vector<8x1xf32> to vector<8x128xf32>
    %21 = arith.mulf %16, %20 : vector<8x128xf32>
    %c0_10 = arith.constant 0 : index
    %c0_11 = arith.constant 0 : index
    %22 = vector.load %arg4[%c0_10, %c0_11] : memref<8x128xf32, #tpu.memory_space<vmem>>, vector<8x128xf32>
    tpu.vector_store %arg4[%c0_10, %c0_11], %21 {strides = array<i32>} : memref<8x128xf32, #tpu.memory_space<vmem>>, vector<8x128xf32>,
    return
  }
  func.func @transform_0(%arg0: i32) -> (i32, i32) {
    %c0_i32 = arith.constant 0 : i32
    %c0_i32_0 = arith.constant 0 : i32
    return %arg0, %c0_i32 : i32, i32
  }
  func.func @transform_1(%arg0: i32) -> (i32, i32) {
    %c0_i32 = arith.constant 0 : i32
    %c0_i32_0 = arith.constant 0 : i32
    %c0_i32_1 = arith.constant 0 : i32
    return %c0_i32, %c0_i32_0 : i32, i32
  }
  func.func @transform_2(%arg0: i32) -> (i32, i32) {
    %c0_i32 = arith.constant 0 : i32
    %c0_i32_0 = arith.constant 0 : i32
    %c0_i32_1 = arith.constant 0 : i32
    return %c0_i32, %c0_i32_0 : i32, i32
  }
  func.func @transform_3(%arg0: i32) -> (i32, i32) {
    %c0_i32 = arith.constant 0 : i32
    %c0_i32_0 = arith.constant 0 : i32
    return %arg0, %c0_i32 : i32, i32
  }
}

</mosaic_0001>

<bundles_post_ra>
// kernel: tpu_custom_call.1
= control target key start
LH: loop header
LB: loop body
LE: loop exit
PB: predicated region body
PF: predicated region fallthrough
CT: control target
= control target key end

     0   :  { %s900_s0 = inlined_call_operand.vmem [shape: f32[8,784], index: 0, kind: input, shape index: {}]   ;;  %s901_s1 = inlined_call_operand.vmem [shape: f32[128,784], index: 1, kind: input, shape index: {}]   ;;  %s902_s2 = inlined_call_operand.vmem [shape: f32[128,128], index: 2, kind: input, shape index: {}]   ;;  %s903_s3 = inlined_call_operand.hbm [shape: f32[8,128], index: 3, kind: output, shape index: {}]  }
   0x1   :  { %v127_v0 = vld [vmem:[%s901_s1 + $0x348] sm:$0xff]  ;;  %v129_v1 = vld [vmem:[%s901_s1 + $0x358] sm:$0xff]  ;;  %v128_v2 = vld [vmem:[%s901_s1 + $0x350] sm:$0xff] }
   0x2   :  { %186 = vmatpush.xpose.msra.mxu0 %v127_v0  ;;  %226 = vmatpush.xpose.msra.mxu2 %v129_v1  ;;  %v120_v3 = vld [vmem:[%s901_s1 + $0x310] sm:$0xff]  ;;  %v122_v4 = vld [vmem:[%s901_s1 + $0x320] sm:$0xff]  ;;  %v121_v5 = vld [vmem:[%s901_s1 + $0x318] sm:$0xff] }
   0x3   :  { %206 = vmatpush.xpose.msra.mxu1 %v128_v2  ;;  %v113_v6 = vld [vmem:[%s901_s1 + $0x2d8] sm:$0xff]  ;;  %v115_v7 = vld [vmem:[%s901_s1 + $0x2e8] sm:$0xff]  ;;  %v114_v8 = vld [vmem:[%s901_s1 + $0x2e0] sm:$0xff] }
   0x4   :  { %v106_v9 = vld [vmem:[%s901_s1 + $0x2a0] sm:$0xff]  ;;  %v108_v10 = vld [vmem:[%s901_s1 + $0x2b0] sm:$0xff]  ;;  %v107_v11 = vld [vmem:[%s901_s1 + $0x2a8] sm:$0xff] }
   0x6   :  { %187 = vmatpush.xpose.msra.mxu0 %v120_v3  ;;  %227 = vmatpush.xpose.msra.mxu2 %v122_v4 }
   0x7   :  { %207 = vmatpush.xpose.msra.mxu1 %v121_v5 }
   0xa   :  { %188 = vmatpush.xpose.msra.mxu0 %v113_v6  ;;  %228 = vmatpush.xpose.msra.mxu2 %v115_v7 }
   0xb   :  { %208 = vmatpush.xpose.msra.mxu1 %v114_v8 }
   0xc   :  { %8 = vsyncpa [#allocation3], 0  ;;  %v99_v12 = vld [vmem:[%s901_s1 + $0x268] sm:$0xff]  ;;  %v101_v13 = vld [vmem:[%s901_s1 + $0x278] sm:$0xff]  ;;  %vm134_vm0 = vcmask 130048   ;;  %s397_s13 = sshll.u32 %s903_s3, 4  ;;  %s398_s13 = int_to_ptr.hbm [resolvable:$true] %s397_s13 }
   0xd   :  { %v100_v14 = vld [vmem:[%s901_s1 + $0x270] sm:$0xff]  ;;  %v94_v16 = vld [vmem:[%s901_s1 + $0x240] sm:$0xff]  ;;  %v93_v17 = vld [vmem:[%s901_s1 + $0x238] sm:$0xff] }
   0xe   :  { %189 = vmatpush.xpose.msra.mxu0 %v106_v9  ;;  %229 = vmatpush.xpose.msra.mxu2 %v108_v10  ;;  %v92_v15 = vld [vmem:[%s901_s1 + $0x230] sm:$0xff]  ;;  %v130_v18 = vld [vmem:[%s901_s1 + $0x360] sm:$0xff]  ;;  %v85_v19 = vld [vmem:[%s901_s1 + $0x1f8] sm:$0xff] }
   0xf   :  { %209 = vmatpush.xpose.msra.mxu1 %v107_v11  ;;  %v87_v20 = vld [vmem:[%s901_s1 + $0x208] sm:$0xff]  ;;  %246 = vmatpush.xpose.msra.mxu3 %v130_v18  ;;  %v86_v21 = vld [vmem:[%s901_s1 + $0x200] sm:$0xff]  ;;  %v80_v24 = vld [vmem:[%s901_s1 + $0x1d0] sm:$0xff] }
  0x10   :  { %v123_v22 = vld [vmem:[%s901_s1 + $0x328] sm:$0xff]  ;;  %v78_v23 = vld [vmem:[%s901_s1 + $0x1c0] sm:$0xff]  ;;  %v116_v26 = vld [vmem:[%s901_s1 + $0x2f0] sm:$0xff] }
  0x11   :  { %v79_v25 = vld [vmem:[%s901_s1 + $0x1c8] sm:$0xff]  ;;  %v73_v28 = vld [vmem:[%s901_s1 + $0x198] sm:$0xff]  ;;  %v72_v29 = vld [vmem:[%s901_s1 + $0x190] sm:$0xff] }
  0x12   :  { %190 = vmatpush.xpose.msra.mxu0 %v99_v12  ;;  %230 = vmatpush.xpose.msra.mxu2 %v101_v13  ;;  %v71_v27 = vld [vmem:[%s901_s1 + $0x188] sm:$0xff]  ;;  %v109_v30 = vld [vmem:[%s901_s1 + $0x2b8] sm:$0xff]  ;;  %v64_v31 = vld [vmem:[%s901_s1 + $0x150] sm:$0xff] }
  0x13   :  { %210 = vmatpush.xpose.msra.mxu1 %v100_v14  ;;  %247 = vmatpush.xpose.msra.mxu3 %v123_v22  ;;  %v66_v32 = vld [vmem:[%s901_s1 + $0x160] sm:$0xff]  ;;  %v65_v33 = vld [vmem:[%s901_s1 + $0x158] sm:$0xff]  ;;  %v59_v36 = vld [vmem:[%s901_s1 + $0x128] sm:$0xff] }
  0x14   :  { %v102_v34 = vld [vmem:[%s901_s1 + $0x280] sm:$0xff]  ;;  %v57_v35 = vld [vmem:[%s901_s1 + $0x118] sm:$0xff]  ;;  %v95_v38 = vld [vmem:[%s901_s1 + $0x248] sm:$0xff] }
  0x15   :  { %v58_v37 = vld [vmem:[%s901_s1 + $0x120] sm:$0xff]  ;;  %v52_v40 = vld [vmem:[%s901_s1 + $0xf0] sm:$0xff]  ;;  %v51_v41 = vld [vmem:[%s901_s1 + $0xe8] sm:$0xff] }
  0x16   :  { %191 = vmatpush.xpose.msra.mxu0 %v92_v15  ;;  %231 = vmatpush.xpose.msra.mxu2 %v94_v16  ;;  %v50_v39 = vld [vmem:[%s901_s1 + $0xe0] sm:$0xff]  ;;  %v88_v42 = vld [vmem:[%s901_s1 + $0x210] sm:$0xff]  ;;  %v43_v43 = vld [vmem:[%s901_s1 + $0xa8] sm:$0xff] }
  0x17   :  { %211 = vmatpush.xpose.msra.mxu1 %v93_v17  ;;  %248 = vmatpush.xpose.msra.mxu3 %v116_v26  ;;  %v45_v44 = vld [vmem:[%s901_s1 + $0xb8] sm:$0xff]  ;;  %v44_v45 = vld [vmem:[%s901_s1 + $0xb0] sm:$0xff]  ;;  %v38_v48 = vld [vmem:[%s901_s1 + $0x80] sm:$0xff] }
  0x18   :  { %v81_v46 = vld [vmem:[%s901_s1 + $0x1d8] sm:$0xff]  ;;  %v36_v47 = vld [vmem:[%s901_s1 + $0x70] sm:$0xff]  ;;  %v74_v50 = vld [vmem:[%s901_s1 + $0x1a0] sm:$0xff] }
  0x19   :  { %v37_v49 = vld [vmem:[%s901_s1 + $0x78] sm:$0xff]  ;;  %v31_v52 = vld [vmem:[%s901_s1 + $0x48] sm:$0xff]  ;;  %v30_v53 = vld [vmem:[%s901_s1 + $0x40] sm:$0xff] }
  0x1a   :  { %192 = vmatpush.xpose.msra.mxu0 %v85_v19  ;;  %232 = vmatpush.xpose.msra.mxu2 %v87_v20  ;;  %v29_v51 = vld [vmem:[%s901_s1 + $0x38] sm:$0xff]  ;;  %v67_v54 = vld [vmem:[%s901_s1 + $0x168] sm:$0xff]  ;;  %v22_v55 = vld [vmem:[%s901_s1] sm:$0xff] }
  0x1b   :  { %212 = vmatpush.xpose.msra.mxu1 %v86_v21  ;;  %249 = vmatpush.xpose.msra.mxu3 %v109_v30  ;;  %v24_v56 = vld [vmem:[%s901_s1 + $0x10] sm:$0xff]  ;;  %v131_v57 = vld [vmem:[%s901_s1 + $0x368] sm:$0xff]  ;;  %v133_v58 = vld [vmem:[%s901_s1 + $0x378] sm:$0xff] }
  0x1c   :  { %v23_v59 = vld [vmem:[%s901_s1 + $0x8] sm:$0xff]  ;;  %v60_v60 = vld [vmem:[%s901_s1 + $0x130] sm:$0xff]  ;;  %v126_v63 = vld [vmem:[%s901_s1 + $0x340] sm:$0xff] }
  0x1d   :  { %v132_v61 = vld [vmem:[%s901_s1 + $0x370] sm:$0xff]  ;;  %v53_v0 = vld [vmem:[%s901_s1 + $0xf8] sm:$0xff]  ;;  %v119_v3 = vld [vmem:[%s901_s1 + $0x308] sm:$0xff] }
  0x1e   :  { %193 = vmatpush.xpose.msra.mxu0 %v78_v23  ;;  %233 = vmatpush.xpose.msra.mxu2 %v80_v24  ;;  %v124_v62 = vld [vmem:[%s901_s1 + $0x330] sm:$0xff]  ;;  %v125_v1 = vld [vmem:[%s901_s1 + $0x338] sm:$0xff]  ;;  %v46_v4 = vld [vmem:[%s901_s1 + $0xc0] sm:$0xff] }
  0x1f   :  { %213 = vmatpush.xpose.msra.mxu1 %v79_v25  ;;  %250 = vmatpush.xpose.msra.mxu3 %v102_v34  ;;  %v117_v2 = vld [vmem:[%s901_s1 + $0x2f8] sm:$0xff]  ;;  %v118_v5 = vld [vmem:[%s901_s1 + $0x300] sm:$0xff]  ;;  %v112_v7 = vld [vmem:[%s901_s1 + $0x2d0] sm:$0xff] }
  0x20   :  { %v110_v6 = vld [vmem:[%s901_s1 + $0x2c0] sm:$0xff]  ;;  %v39_v8 = vld [vmem:[%s901_s1 + $0x88] sm:$0xff]  ;;  %v105_v11 = vld [vmem:[%s901_s1 + $0x298] sm:$0xff] }
  0x21   :  { %v111_v9 = vld [vmem:[%s901_s1 + $0x2c8] sm:$0xff]  ;;  %v32_v12 = vld [vmem:[%s901_s1 + $0x50] sm:$0xff]  ;;  %v98_v15 = vld [vmem:[%s901_s1 + $0x260] sm:$0xff] }
  0x22   :  { %194 = vmatpush.xpose.msra.mxu0 %v71_v27  ;;  %234 = vmatpush.xpose.msra.mxu2 %v73_v28  ;;  %v103_v10 = vld [vmem:[%s901_s1 + $0x288] sm:$0xff]  ;;  %v104_v13 = vld [vmem:[%s901_s1 + $0x290] sm:$0xff]  ;;  %v25_v16 = vld [vmem:[%s901_s1 + $0x18] sm:$0xff] }
  0x23   :  { %214 = vmatpush.xpose.msra.mxu1 %v72_v29  ;;  %251 = vmatpush.xpose.msra.mxu3 %v95_v38  ;;  %v96_v14 = vld [vmem:[%s901_s1 + $0x250] sm:$0xff]  ;;  %v97_v17 = vld [vmem:[%s901_s1 + $0x258] sm:$0xff]  ;;  %v91_v20 = vld [vmem:[%s901_s1 + $0x228] sm:$0xff] }
  0x24   :  { %v17_v18 = vld [vmem:[%s900_s0 + $0x10] sm:$0xff]  ;;  %v89_v19 = vld [vmem:[%s901_s1 + $0x218] sm:$0xff]  ;;  %v15_v21 = vld [vmem:[%s900_s0] sm:$0xff] }
  0x25   :  { %v18_v22 = vld [vmem:[%s900_s0 + $0x18] sm:$0xff]  ;;  %v90_v23 = vld [vmem:[%s901_s1 + $0x220] sm:$0xff]  ;;  %v16_v24 = vld [vmem:[%s900_s0 + $0x8] sm:$0xff] }
  0x26   :  { %195 = vmatpush.xpose.msra.mxu0 %v64_v31  ;;  %235 = vmatpush.xpose.msra.mxu2 %v66_v32  ;;  %v82_v25 = vld [vmem:[%s901_s1 + $0x1e0] sm:$0xff]  ;;  %v84_v26 = vld [vmem:[%s901_s1 + $0x1f0] sm:$0xff]  ;;  %v83_v27 = vld [vmem:[%s901_s1 + $0x1e8] sm:$0xff] }
  0x27   :  { %215 = vmatpush.xpose.msra.mxu1 %v65_v33  ;;  %252 = vmatpush.xpose.msra.mxu3 %v88_v42  ;;  %v75_v28 = vld [vmem:[%s901_s1 + $0x1a8] sm:$0xff]  ;;  %v77_v29 = vld [vmem:[%s901_s1 + $0x1b8] sm:$0xff]  ;;  %v76_v30 = vld [vmem:[%s901_s1 + $0x1b0] sm:$0xff] }
  0x28   :  { %v68_v31 = vld [vmem:[%s901_s1 + $0x170] sm:$0xff]  ;;  %v70_v32 = vld [vmem:[%s901_s1 + $0x180] sm:$0xff]  ;;  %v342_v33 = vld [vmem:[%s902_s2 + $0x78] sm:$0xff] }
  0x29   :  { %v69_v34 = vld [vmem:[%s901_s1 + $0x178] sm:$0xff]  ;;  %v62_v38 = vld [vmem:[%s901_s1 + $0x140] sm:$0xff]  ;;  %v55_v42 = vld [vmem:[%s901_s1 + $0x108] sm:$0xff] }
  0x2a   :  { %196 = vmatpush.xpose.msra.mxu0 %v57_v35  ;;  %236 = vmatpush.xpose.msra.mxu2 %v59_v36  ;;  %v341_v35 = vld [vmem:[%s902_s2 + $0x70] sm:$0xff]  ;;  %v61_v36 = vld [vmem:[%s901_s1 + $0x138] sm:$0xff] }
  0x2b   :  { %216 = vmatpush.xpose.msra.mxu1 %v58_v37  ;;  %253 = vmatpush.xpose.msra.mxu3 %v81_v46  ;;  %v63_v37 = vld [vmem:[%s901_s1 + $0x148] sm:$0xff]  ;;  %v48_v46 = vld [vmem:[%s901_s1 + $0xd0] sm:$0xff] }
  0x2e   :  { %197 = vmatpush.xpose.msra.mxu0 %v50_v39  ;;  %237 = vmatpush.xpose.msra.mxu2 %v52_v40  ;;  %v340_v39 = vld [vmem:[%s902_s2 + $0x68] sm:$0xff]  ;;  %v54_v40 = vld [vmem:[%s901_s1 + $0x100] sm:$0xff] }
  0x2f   :  { %217 = vmatpush.xpose.msra.mxu1 %v51_v41  ;;  %254 = vmatpush.xpose.msra.mxu3 %v74_v50  ;;  %v56_v41 = vld [vmem:[%s901_s1 + $0x110] sm:$0xff]  ;;  %v41_v50 = vld [vmem:[%s901_s1 + $0x98] sm:$0xff] }
  0x32   :  { %198 = vmatpush.xpose.msra.mxu0 %v43_v43  ;;  %238 = vmatpush.xpose.msra.mxu2 %v45_v44  ;;  %v339_v43 = vld [vmem:[%s902_s2 + $0x60] sm:$0xff]  ;;  %v47_v44 = vld [vmem:[%s901_s1 + $0xc8] sm:$0xff] }
  0x33   :  { %218 = vmatpush.xpose.msra.mxu1 %v44_v45  ;;  %255 = vmatpush.xpose.msra.mxu3 %v67_v54  ;;  %v49_v45 = vld [vmem:[%s901_s1 + $0xd8] sm:$0xff]  ;;  %v34_v54 = vld [vmem:[%s901_s1 + $0x60] sm:$0xff] }
  0x36   :  { %199 = vmatpush.xpose.msra.mxu0 %v36_v47  ;;  %239 = vmatpush.xpose.msra.mxu2 %v38_v48  ;;  %v338_v47 = vld [vmem:[%s902_s2 + $0x58] sm:$0xff]  ;;  %v40_v48 = vld [vmem:[%s901_s1 + $0x90] sm:$0xff] }
  0x37   :  { %219 = vmatpush.xpose.msra.mxu1 %v37_v49  ;;  %256 = vmatpush.xpose.msra.mxu3 %v60_v60  ;;  %v42_v49 = vld [vmem:[%s901_s1 + $0xa0] sm:$0xff] }
  0x38   :  { %v19_v60 = vld [vmem:[%s900_s0 + $0x20] sm:$0xff] }
  0x3a   :  { %200 = vmatpush.xpose.msra.mxu0 %v29_v51  ;;  %240 = vmatpush.xpose.msra.mxu2 %v31_v52  ;;  %v337_v51 = vld [vmem:[%s902_s2 + $0x50] sm:$0xff]  ;;  %v33_v52 = vld [vmem:[%s901_s1 + $0x58] sm:$0xff] }
  0x3b   :  { %220 = vmatpush.xpose.msra.mxu1 %v30_v53  ;;  %257 = vmatpush.xpose.msra.mxu3 %v53_v0  ;;  %v35_v53 = vld [vmem:[%s901_s1 + $0x68] sm:$0xff]  ;;  %v333_v0 = vld [vmem:[%s902_s2 + $0x30] sm:$0xff] }
  0x3e   :  { %201 = vmatpush.xpose.msra.mxu0 %v22_v55  ;;  %241 = vmatpush.xpose.msra.mxu2 %v24_v56  ;;  %v336_v55 = vld [vmem:[%s902_s2 + $0x48] sm:$0xff]  ;;  %v26_v56 = vld [vmem:[%s901_s1 + $0x20] sm:$0xff] }
  0x3f   :  { %221 = vmatpush.xpose.msra.mxu1 %v23_v59  ;;  %258 = vmatpush.xpose.msra.mxu3 %v46_v4  ;;  %v335_v59 = vld [vmem:[%s902_s2 + $0x40] sm:$0xff]  ;;  %v329_v4 = vld [vmem:[%s902_s2 + $0x10] sm:$0xff] }
  0x41   :  { %242 = vmatmul.f32.vlgmr.msra.gmra.mxu2 %v17_v18  ;;  %202 = vmatmul.f32.vlgmr.msra.gmra.mxu0 %v15_v21  ;;  %v363_v21 = vlaneseq }
  0x42   :  { %266 = vmatpush.xpose.msrb.mxu0 %v131_v57  ;;  %406 = vmatpush.xpose.msk.msrb.mxu2 %vm134_vm0, %v133_v58  ;;  %v28_v57 = vld [vmem:[%s901_s1 + $0x30] sm:$0xff]  ;;  %v27_v58 = vld [vmem:[%s901_s1 + $0x28] sm:$0xff] }
  0x43   :  { %286 = vmatpush.xpose.msrb.mxu1 %v132_v61  ;;  %259 = vmatpush.xpose.msra.mxu3 %v39_v8  ;;  %v21_v61 = vld [vmem:[%s900_s0 + $0x30] sm:$0xff] }
  0x44   :  { %222 = vmatmul.f32.vlgmr.msra.gmra.mxu1 %v16_v24 }
  0x46   :  { %267 = vmatpush.xpose.msrb.mxu0 %v124_v62  ;;  %407 = vmatpush.xpose.msk.msrb.mxu2 %vm134_vm0, %v126_v63  ;;  %v20_v62 = vld [vmem:[%s900_s0 + $0x28] sm:$0xff]  ;;  %v334_v63 = vld [vmem:[%s902_s2 + $0x38] sm:$0xff] }
  0x47   :  { %287 = vmatpush.xpose.msrb.mxu1 %v125_v1  ;;  %260 = vmatpush.xpose.msra.mxu3 %v32_v12  ;;  %v332_v1 = vld [vmem:[%s902_s2 + $0x28] sm:$0xff] }
  0x4a   :  { %268 = vmatpush.xpose.msrb.mxu0 %v117_v2  ;;  %408 = vmatpush.xpose.msk.msrb.mxu2 %vm134_vm0, %v119_v3  ;;  %v331_v2 = vld [vmem:[%s902_s2 + $0x20] sm:$0xff]  ;;  %v330_v3 = vld [vmem:[%s902_s2 + $0x18] sm:$0xff] }
  0x4b   :  { %288 = vmatpush.xpose.msrb.mxu1 %v118_v5  ;;  %261 = vmatpush.xpose.msra.mxu3 %v25_v16  ;;  %v328_v5 = vld [vmem:[%s902_s2 + $0x8] sm:$0xff] }
  0x4e   :  { %269 = vmatpush.xpose.msrb.mxu0 %v110_v6  ;;  %409 = vmatpush.xpose.msk.msrb.mxu2 %vm134_vm0, %v112_v7  ;;  %v327_v6 = vld [vmem:[%s902_s2] sm:$0xff]  ;;  %s454_s2 = smov [#allocation2]  }
  0x4f   :  { %289 = vmatpush.xpose.msrb.mxu1 %v111_v9  ;;  %262 = vmatmul.f32.vlgmr.msra.gmra.mxu3 %v18_v22  ;;  %v364_v22 = vand.u32 127, %v363_v21  ;;  %s395_s10 = sshll.u32 %s454_s2, 4  ;;  %s396_s10 = int_to_ptr.vmem [resolvable:$true] %s395_s10 }
  0x50   :  { %343 = vmatpush.xpose.msrb.mxu3 %v342_v33 }
  0x51   :  { %vm365_vm1 = vcmp.lt.s32.totalorder %v364_v22, 10 }
  0x52   :  { %270 = vmatpush.xpose.msrb.mxu0 %v103_v10  ;;  %410 = vmatpush.xpose.msk.msrb.mxu2 %vm134_vm0, %v105_v11 }
  0x53   :  { %290 = vmatpush.xpose.msrb.mxu1 %v104_v13 }
  0x54   :  { %344 = vmatpush.xpose.msrb.mxu3 %v341_v35 }
  0x56   :  { %271 = vmatpush.xpose.msrb.mxu0 %v96_v14  ;;  %411 = vmatpush.xpose.msk.msrb.mxu2 %vm134_vm0, %v98_v15 }
  0x57   :  { %291 = vmatpush.xpose.msrb.mxu1 %v97_v17 }
  0x58   :  { %345 = vmatpush.xpose.msrb.mxu3 %v340_v39 }
  0x5a   :  { %272 = vmatpush.xpose.msrb.mxu0 %v89_v19  ;;  %412 = vmatpush.xpose.msk.msrb.mxu2 %vm134_vm0, %v91_v20 }
  0x5b   :  { %292 = vmatpush.xpose.msrb.mxu1 %v90_v23 }
  0x5c   :  { %346 = vmatpush.xpose.msrb.mxu3 %v339_v43 }
  0x5e   :  { %273 = vmatpush.xpose.msrb.mxu0 %v82_v25  ;;  %413 = vmatpush.xpose.msk.msrb.mxu2 %vm134_vm0, %v84_v26 }
  0x5f   :  { %293 = vmatpush.xpose.msrb.mxu1 %v83_v27 }
  0x60   :  { %347 = vmatpush.xpose.msrb.mxu3 %v338_v47 }
  0x62   :  { %274 = vmatpush.xpose.msrb.mxu0 %v75_v28  ;;  %414 = vmatpush.xpose.msk.msrb.mxu2 %vm134_vm0, %v77_v29 }
  0x63   :  { %294 = vmatpush.xpose.msrb.mxu1 %v76_v30 }
  0x64   :  { %348 = vmatpush.xpose.msrb.mxu3 %v337_v51 }
  0x66   :  { %275 = vmatpush.xpose.msrb.mxu0 %v68_v31  ;;  %415 = vmatpush.xpose.msk.msrb.mxu2 %vm134_vm0, %v70_v32 }
  0x67   :  { %295 = vmatpush.xpose.msrb.mxu1 %v69_v34 }
  0x68   :  { %349 = vmatpush.xpose.msrb.mxu3 %v336_v55 }
  0x6a   :  { %276 = vmatpush.xpose.msrb.mxu0 %v61_v36  ;;  %416 = vmatpush.xpose.msk.msrb.mxu2 %vm134_vm0, %v63_v37 }
  0x6b   :  { %296 = vmatpush.xpose.msrb.mxu1 %v62_v38 }
  0x6c   :  { %350 = vmatpush.xpose.msrb.mxu3 %v335_v59 }
  0x6e   :  { %277 = vmatpush.xpose.msrb.mxu0 %v54_v40  ;;  %417 = vmatpush.xpose.msk.msrb.mxu2 %vm134_vm0, %v56_v41 }
  0x6f   :  { %297 = vmatpush.xpose.msrb.mxu1 %v55_v42 }
  0x70   :  { %351 = vmatpush.xpose.msrb.mxu3 %v334_v63 }
  0x72   :  { %278 = vmatpush.xpose.msrb.mxu0 %v47_v44  ;;  %418 = vmatpush.xpose.msk.msrb.mxu2 %vm134_vm0, %v49_v45 }
  0x73   :  { %298 = vmatpush.xpose.msrb.mxu1 %v48_v46 }
  0x74   :  { %352 = vmatpush.xpose.msrb.mxu3 %v333_v0 }
  0x76   :  { %279 = vmatpush.xpose.msrb.mxu0 %v40_v48  ;;  %419 = vmatpush.xpose.msk.msrb.mxu2 %vm134_vm0, %v42_v49 }
  0x77   :  { %299 = vmatpush.xpose.msrb.mxu1 %v41_v50 }
  0x78   :  { %353 = vmatpush.xpose.msrb.mxu3 %v332_v1 }
  0x7a   :  { %280 = vmatpush.xpose.msrb.mxu0 %v33_v52  ;;  %420 = vmatpush.xpose.msk.msrb.mxu2 %vm134_vm0, %v35_v53 }
  0x7b   :  { %300 = vmatpush.xpose.msrb.mxu1 %v34_v54 }
  0x7c   :  { %354 = vmatpush.xpose.msrb.mxu3 %v331_v2 }
  0x7e   :  { %281 = vmatpush.xpose.msrb.mxu0 %v26_v56  ;;  %421 = vmatpush.xpose.msk.msrb.mxu2 %vm134_vm0, %v28_v57 }
  0x7f   :  { %301 = vmatpush.xpose.msrb.mxu1 %v27_v58 }
  0x80   :  { %355 = vmatpush.xpose.msrb.mxu3 %v330_v3 }
  0x81   :  { %282 = vmatmul.f32.vlgmr.msrb.gmra.mxu0 %v19_v60  ;;  %422 = vmatmul.msk.f32.vlgmr.msrb.gmra.mxu2 %vm134_vm0, %v21_v61 }
  0x82   :  { %302 = vmatmul.f32.vlgmr.msrb.gmra.mxu1 %v20_v62 }
  0x84   :  { %356 = vmatpush.xpose.msrb.mxu3 %v329_v4 }
  0x88   :  { %357 = vmatpush.xpose.msrb.mxu3 %v328_v5 }
  0x8c   :  { %358 = vmatpush.xpose.msrb.mxu3 %v327_v6 }
  0xbe   :  { %v203_v8 = vpop.f32.mrf.mxu0 }
  0xc1   :  { %v223_v7 = vpop.f32.mrf.mxu1 }
  0xc2   :  { %v224_v9 = vadd.f32 %v223_v7, %v203_v8 }
  0xc4   :  { %v243_v10 = vpop.f32.mrf.mxu2 }
  0xc5   :  { %v244_v11 = vadd.f32 %v243_v10, %v224_v9 }
  0xd2   :  { %v263_v12 = vpop.f32.mrf.mxu3 }
  0xd3   :  { %v264_v13 = vadd.f32 %v263_v12, %v244_v11 }
  0xfe   :  { %v283_v14 = vpop.f32.mrf.mxu0 }
  0xff   :  { %v284_v15 = vadd.f32 %v283_v14, %v264_v13  ;;  %v303_v16 = vpop.f32.mrf.mxu1 }
 0x101   :  { %v304_v17 = vadd.f32 %v303_v16, %v284_v15 }
 0x104   :  { %v323_v18 = vpop.f32.mrf.mxu2 }
 0x105   :  { %v324_v19 = vadd.f32 %v323_v18, %v304_v17 }
 0x107   :  { %v326_v20 = vmax.f32 %v324_v19, 0.0 }
 0x109   :  { %359 = vmatmul.f32.vlgmr.msrb.gmra.mxu3 %v326_v20 }
 0x18c   :  { %v360_v23 = vpop.f32.mrf.mxu3 }
 0x18d   :  { %v366_v24 = vsel %vm365_vm1, %v360_v23, -1e+30 }
 0x18e   :  { %367 = vmax.xlane.f32.xlu0 %v366_v24 }
 0x201   :  { %v368_v25 = vpop.xlane.xlu0 %367 }
 0x202   :  { %v369_v26 = vsub.f32 %v366_v24, %v368_v25 }
 0x204   :  { %v370_v27 = vmul.f32 1.442695, %v369_v26 }
 0x206   :  { %424 = vpow2.f32 %v370_v27 }
 0x20c   :  { %v425_v28 = vpop.eup %424 }
 0x20d   :  { %372 = vadd.xlane.f32.xlu0 %v425_v28 }
 0x280   :  { %v373_v29 = vpop.xlane.xlu0 %372 }
 0x281   :  { %426 = vrcp.f32 %v373_v29  ;;  %v385_v33 = vand.u32 2147483648, %v373_v29  ;;  %v383_v35 = vand.u32 2147483647, %v373_v29  ;;  %vm379_vm3 = vweird.f32 %v373_v29 }
 0x283   :  { %v386_v37 = vor.u32 1.1754944e-38, %v385_v33  ;;  %vm384_vm5 = vcmp.eq.f32.partialorder %v383_v35, 8.507059e+37 }
 0x287   :  { %v427_v30 = vpop.eup %426 }
 0x288   :  { %v375_v31 = vmul.f32 %v427_v30, %v373_v29  ;;  %vm380_vm2 = vweird.f32 %v427_v30 }
 0x289   :  { %vm381_vm4 = vmor %vm379_vm3, %vm380_vm2 }
 0x28a   :  { %v376_v32 = vsub.f32 1.0, %v375_v31 }
 0x28c   :  { %v377_v34 = vmul.f32 %v427_v30, %v376_v32 }
 0x28e   :  { %v378_v36 = vadd.f32 %v427_v30, %v377_v34 }
 0x290   :  { %v382_v38 = vsel %vm381_vm4, %v427_v30, %v378_v36 }
 0x291   :  { %v387_v39 = vsel %vm384_vm5, %v386_v37, %v382_v38 }
 0x292   :  { %v388_v40 = vmul.f32 %v425_v28, %v387_v39 }
 0x294   :  { %389 = vst [vmem:[#allocation2] sm:$0xff] %v388_v40 }
 0x295   :  { %400 = dma.vmem_to_hbm [thread:$0]  %s396_s10, 128, %s398_s13, [#allocation3]  }
 0x296   :  { %452 = dma.done.wait [#allocation3], 128  }
 0x297   :  { %453 = vsyncadd [#allocation3], 4294967168 }
 0x298   :  { %405 = vsyncpa [#allocation3], 1 }

</bundles_post_ra>
